<compile_context>
chip_gen: v7x
topology: tpu7x:2x2x1
jax: 0.10.0
libtpu: 0.0.40
codegen_flags: <defaults>
</compile_context>

<pallas_src>
import jax
import jax.numpy as jnp
from jax.experimental import pallas as pl
from jax.experimental.pallas import tpu as pltpu


def sem_head_kernel(x_ref, w_ref, b_ref, o_ref):
    # x_ref: (Nt, C, HW) native dtype
    # w_ref: (C, K_pad) f32, pre-scaled by 1/(H*W*T)
    # b_ref: (1, K_pad) f32, pre-scaled by 1/T
    # o_ref: (Nt, K_pad) f32
    x32 = x_ref[...].astype(jnp.float32)            # f32 accumulation (v5e-safe)
    pooled = jnp.sum(x32, axis=-1)                  # (Nt, C)  global-avg-pool (scale folded into w)
    scores = jnp.dot(pooled, w_ref[...],
                     preferred_element_type=jnp.float32)   # MXU classifier matmul
    o_ref[...] = (scores + b_ref[...]).astype(o_ref.dtype)


def sem_head_forward(fea_nchw, w, b, T=1.0, *, tile_bytes=4 << 20):
    """fea_nchw: (N, C, H, W) any float dtype; w: (C, K); b: (K,).

    Returns (N, K) cls_score in float32 (== (mean_{H,W}(fea) @ w + b) / T).
    """
    N, C, H, W = fea_nchw.shape
    HW = H * W
    K = w.shape[1]
    K_pad = ((K + 127) // 128) * 128

    # Free (contiguous) reshape; keep the native dtype on the HBM wire.
    x = fea_nchw.reshape(N, C, HW)

    # Fold 1/(H*W) and 1/T into the tiny classifier params once (wrapper-side;
    # these are (C,K)/(K,), not the big activation, so this is not pre-scaling x).
    scale = 1.0 / (float(HW) * float(T))
    w_s = w.astype(jnp.float32) * scale
    b_s = b.astype(jnp.float32) * (1.0 / float(T))
    w_p = jnp.zeros((C, K_pad), jnp.float32).at[:, :K].set(w_s)
    b_p = jnp.zeros((1, K_pad), jnp.float32).at[0, :K].set(b_s)

    # N-tile sized from a VMEM budget (double-buffered by the Pallas pipeline).
    itemsize = jnp.dtype(x.dtype).itemsize
    row_bytes = C * HW * itemsize
    nt = max(1, tile_bytes // row_bytes)
    if nt >= N:
        nt = N                                  # single / full-extent block
    else:
        nt = max(8, (nt // 8) * 8)              # keep output 2nd-minor dim 8-aligned
        nt = min(nt, N)
    grid = (pl.cdiv(N, nt),)

    cost = pl.CostEstimate(
        flops=2 * N * C * K_pad + N * C * HW,
        transcendentals=0,
        bytes_accessed=N * C * HW * itemsize + C * K_pad * 4 + N * K_pad * 4,
    )

    out_pad = pl.pallas_call(
        sem_head_kernel,
        out_shape=jax.ShapeDtypeStruct((N, K_pad), jnp.float32),
        grid=grid,
        in_specs=[
            pl.BlockSpec((nt, C, HW), lambda i: (i, 0, 0)),   # streamed over N
            pl.BlockSpec((C, K_pad), lambda i: (0, 0)),       # resident
            pl.BlockSpec((1, K_pad), lambda i: (0, 0)),       # resident
        ],
        out_specs=pl.BlockSpec((nt, K_pad), lambda i: (i, 0)),
        compiler_params=pltpu.CompilerParams(
            dimension_semantics=("parallel",),
            vmem_limit_bytes=32 * 1024 * 1024,
        ),
        cost_estimate=cost,
    )(x, w_p, b_p)

    return out_pad[:, :K]


if __name__ == "__main__":
    # Small deterministic example consistent with SemHead:
    #   batch=2, channels=4, spatial=16x16, num_cluster=10, T=1
    N, C, H, W = 2, 4, 16, 16
    num_cluster = 10
    T = 1.0

    key = jax.random.PRNGKey(0)
    k_fea, k_w, k_b = jax.random.split(key, 3)

    fea = jax.random.normal(k_fea, (N, C, H, W), dtype=jnp.float32)
    # Deterministic synthetic classifier (nn.Linear(C, num_cluster)) params.
    w = jax.random.normal(k_w, (C, num_cluster), dtype=jnp.float32) * 0.1
    b = jax.random.normal(k_b, (num_cluster,), dtype=jnp.float32) * 0.01

    # TODO(synk): optional feature_conv submodule / fea_fc=True path not
    # modeled; default SemHead config uses feature_conv=None, fea_fc=False.

    cls_score = sem_head_forward(fea, w, b, T=T)
    cls_score = jax.block_until_ready(cls_score)

    # Reference check in plain JAX (same math as the PyTorch forward).
    ref = (fea.mean(axis=(2, 3)) @ w + b) / T
    assert cls_score.shape == (N, num_cluster)
    assert jnp.allclose(cls_score, ref, atol=1e-5, rtol=1e-5)

    print("KERNEL_OK")
</pallas_src>

<mosaic_0001>
module attributes {stable_mosaic.version = 11 : i64} {
  func.func @sem_head_kernel(%arg0: i32, %arg1: memref<2x4x256xf32, #tpu.memory_space<vmem>>, %arg2: memref<4x128xf32, #tpu.memory_space<vmem>>, %arg3: memref<1x128xf32, #tpu.memory_space<vmem>>, %arg4: memref<2x128xf32, #tpu.memory_space<vmem>>) attributes {dimension_semantics = [#tpu.dimension_semantics<parallel>], iteration_bounds = array<i64: 1>, scalar_prefetch = 0 : i64, scratch_operands = 0 : i64, tpu.core_type = #tpu.core_type<tc>, window_params = [{transform_indices = @transform_0, window_bounds = array<i64: 2, 4, 256>}, {pipeline_mode = #tpu.pipeline_mode<synchronous>, transform_indices = @transform_1, window_bounds = array<i64: 4, 128>}, {pipeline_mode = #tpu.pipeline_mode<synchronous>, transform_indices = @transform_2, window_bounds = array<i64: 1, 128>}, {transform_indices = @transform_3, window_bounds = array<i64: 2, 128>}]} {
    %c0 = arith.constant 0 : index
    %c0_0 = arith.constant 0 : index
    %c0_1 = arith.constant 0 : index
    %0 = vector.load %arg1[%c0, %c0_0, %c0_1] : memref<2x4x256xf32, #tpu.memory_space<vmem>>, vector<2x4x256xf32>
    %cst = arith.constant dense<0.000000e+00> : vector<2x4xf32>
    %1 = vector.multi_reduction <add>, %0, %cst [2] : vector<2x4x256xf32> to vector<2x4xf32>
    %c0_2 = arith.constant 0 : index
    %c0_3 = arith.constant 0 : index
    %2 = vector.load %arg2[%c0_2, %c0_3] : memref<4x128xf32, #tpu.memory_space<vmem>>, vector<4x128xf32>
    %cst_4 = arith.constant dense<0.000000e+00> : vector<2x128xf32>
    %3 = tpu.matmul %1, %2, %cst_4 {dimension_numbers = #tpu.dot_dimension_numbers<[1], [0], [0], [1], [0, 0, 1, 1], [], []>} : vector<2x4xf32>, vector<4x128xf32>, vector<2x128xf32> -> vector<2x128xf32>
    %c0_5 = arith.constant 0 : index
    %c0_6 = arith.constant 0 : index
    %4 = vector.load %arg3[%c0_5, %c0_6] : memref<1x128xf32, #tpu.memory_space<vmem>>, vector<1x128xf32>
    %5 = vector.broadcast %4 : vector<1x128xf32> to vector<2x128xf32>
    %6 = arith.addf %3, %5 : vector<2x128xf32>
    %c0_7 = arith.constant 0 : index
    %c0_8 = arith.constant 0 : index
    %7 = vector.load %arg4[%c0_7, %c0_8] : memref<2x128xf32, #tpu.memory_space<vmem>>, vector<2x128xf32>
    tpu.vector_store %arg4[%c0_7, %c0_8], %6 {strides = array<i32>} : memref<2x128xf32, #tpu.memory_space<vmem>>, vector<2x128xf32>,
    return
  }
  func.func @transform_0(%arg0: i32) -> (i32, i32, i32) {
    %c0_i32 = arith.constant 0 : i32
    %c0_i32_0 = arith.constant 0 : i32
    %c0_i32_1 = arith.constant 0 : i32
    return %arg0, %c0_i32, %c0_i32_0 : i32, i32, i32
  }
  func.func @transform_1(%arg0: i32) -> (i32, i32) {
    %c0_i32 = arith.constant 0 : i32
    %c0_i32_0 = arith.constant 0 : i32
    %c0_i32_1 = arith.constant 0 : i32
    return %c0_i32, %c0_i32_0 : i32, i32
  }
  func.func @transform_2(%arg0: i32) -> (i32, i32) {
    %c0_i32 = arith.constant 0 : i32
    %c0_i32_0 = arith.constant 0 : i32
    %c0_i32_1 = arith.constant 0 : i32
    return %c0_i32, %c0_i32_0 : i32, i32
  }
  func.func @transform_3(%arg0: i32) -> (i32, i32) {
    %c0_i32 = arith.constant 0 : i32
    %c0_i32_0 = arith.constant 0 : i32
    return %arg0, %c0_i32 : i32, i32
  }
}

</mosaic_0001>

<bundles_post_ra>
// kernel: tpu_custom_call.1
= control target key start
LH: loop header
LB: loop body
LE: loop exit
PB: predicated region body
PF: predicated region fallthrough
CT: control target
= control target key end

     0   :  { %8 = vsyncpa [#allocation3], 0  ;;  %s337_s0 = inlined_call_operand.hbm [shape: f32[2,4,256], index: 0, kind: input, shape index: {}]   ;;  %s338_s1 = inlined_call_operand.hbm [shape: f32[4,128], index: 1, kind: input, shape index: {}]   ;;  %s339_s2 = inlined_call_operand.vmem [shape: f32[1,128], index: 2, kind: input, shape index: {}]   ;;  %s340_s3 = inlined_call_operand.hbm [shape: f32[2,128], index: 3, kind: output, shape index: {}]  }
   0x1   :  { %9 = vsyncpa [#allocation6], 0 }
   0x2   :  { %10 = vsyncpa [#allocation4], 0  ;;  %s266_s12 = smov [#allocation2]   ;;  %s194_s16 = scalar_lea.hbm %s337_s0, 256 }
   0x3   :  { %s16_s13 = sshll.u32 %s266_s12, 4  ;;  %p195_p0 = scmp.ne.s32.totalorder %s337_s0, %s194_s16  ;;  %s17_s13 = int_to_ptr.vmem [resolvable:$true] %s16_s13 }
   0x4   :  { %p198_p1 = scmp.lt.u32.totalorder %s194_s16, %s337_s0 }
   0x6   :  { %p200_p2 = pnand %p198_p1, %p195_p0 }
   0x8   :  { %203 = shalt.err (!%p200_p2)
}
   0x9   :  { %s204_s21 = scalar_lea.vmem %s17_s13, 256  ;;  %p209_p4 = scmp.lt.s32.totalorder %s17_s13, %s17_s13 }
   0xa   :  { %p205_p3 = scmp.ne.s32.totalorder %s17_s13, %s204_s21  ;;  %p210_p5 = scmp.lt.s32.totalorder %s204_s21, %s204_s21 }
   0xc   :  { %p211_p6 = por %p210_p5, %p209_p4 }
   0xe   :  { %p212_p7 = pnand %p211_p6, %p205_p3 }
  0x10   :  { %215 = shalt.err (!%p212_p7)
}
  0x11   :  { %s267_s22 = smov 128   ;;  %s268_s23 = smov 8  }
  0x12   :  { %22 = dma.hbm_to_vmem [thread:$0]  %s337_s0, 256, %s17_s13, [#allocation3], %s267_s22, %s267_s22, %s268_s23  }
  0x13   :  { %s269_s26 = smov [#allocation5]   ;;  %s216_s30 = scalar_lea.hbm %s338_s1, 64 }
  0x14   :  { %s29_s27 = sshll.u32 %s269_s26, 4  ;;  %p217_p8 = scmp.ne.s32.totalorder %s338_s1, %s216_s30  ;;  %s30_s27 = int_to_ptr.vmem [resolvable:$true] %s29_s27 }
  0x15   :  { %p220_p9 = scmp.lt.u32.totalorder %s216_s30, %s338_s1 }
  0x17   :  { %p222_p10 = pnand %p220_p9, %p217_p8 }
  0x19   :  { %225 = shalt.err (!%p222_p10)
}
  0x1a   :  { %s226_s8 = scalar_lea.vmem %s30_s27, 64  ;;  %p231_p12 = scmp.lt.s32.totalorder %s30_s27, %s30_s27 }
  0x1b   :  { %p227_p11 = scmp.ne.s32.totalorder %s30_s27, %s226_s8  ;;  %p232_p13 = scmp.lt.s32.totalorder %s226_s8, %s226_s8 }
  0x1d   :  { %p233_p0 = por %p232_p13, %p231_p12 }
  0x1f   :  { %p234_p1 = pnand %p233_p0, %p227_p11 }
  0x21   :  { %237 = shalt.err (!%p234_p1)
}
  0x22   :  { %32 = dma.hbm_to_vmem [thread:$0]  %s338_s1, 64, %s30_s27, [#allocation6]  }
  0x23   :  { %260 = dma.done.wait [#allocation3], 256  }
  0x24   :  { %261 = vsyncadd [#allocation3], 4294967040 }
  0x25   :  { %262 = dma.done.wait [#allocation6], 64  }
  0x26   :  { %263 = vsyncadd [#allocation6], 4294967232  ;;  %vm49_vm0 = vcmask 1043456   ;;  %v41_v0 = vld [vmem:[#allocation2] sm:$0xff]  ;;  %v42_v1 = vld [vmem:[#allocation2 + $0x8] sm:$0xff]  ;;  %v270_v11 = vmov 0.0   ;;  %v70_v12 = vlaneseq }
  0x27   :  { %v45_v2 = vcombine.high %v41_v0, %v41_v0  ;;  %v50_v3 = vsel %vm49_vm0, %v41_v0, 0.0  ;;  %v46_v4 = vcombine.high %v42_v1, %v42_v1  ;;  %v55_v6 = vsel %vm49_vm0, %v42_v1, 0.0  ;;  %v60_v10 = vld [vmem:[#allocation5] sm:$0xf]  ;;  %180 = vmatprep.subr.mxu0 %v270_v11  ;;  %v175_v21 = vld [vmem:[%s339_s2] ss:$0 sm:$0xff] }
  0x28   :  { %vm271_vm1 = vmmov 0   ;;  %181 = vmatpush3.msk.msra.mxu0 %vm49_vm0, %v60_v10  ;;  %v71_v13 = vand.u32 127, %v70_v12  ;;  %v73_v14 = vshrl.u32 %v70_v12, 7  ;;  %vm80_vm2 = vcmask 1041409   ;;  %s272_s11 = smov [#allocation7]  }
  0x29   :  { %v51_v5 = vsel %vm49_vm0, %v45_v2, 0.0  ;;  %v56_v7 = vsel %vm49_vm0, %v46_v4, 0.0  ;;  %182 = vmatprep.mubr.msk.f32.mxu0 %vm271_vm1, %v270_v11  ;;  %vm82_vm3 = vcmask 31744   ;;  %s165_s12 = sshll.u32 %s272_s11, 4  ;;  %s166_s12 = int_to_ptr.vmem [resolvable:$true] %s165_s12 }
  0x2a   :  { %v52_v8 = vadd.f32 %v51_v5, %v50_v3  ;;  %v57_v9 = vadd.f32 %v56_v7, %v55_v6  ;;  %v74_v16 = vsub.s32 %v71_v13, %v73_v14  ;;  %s238_s13 = scalar_lea.vmem %s166_s12, 32  ;;  %p243_p3 = scmp.lt.s32.totalorder %s166_s12, %s166_s12 }
  0x2b   :  { %p239_p2 = scmp.ne.s32.totalorder %s166_s12, %s238_s13  ;;  %p244_p4 = scmp.lt.s32.totalorder %s238_s13, %s238_s13 }
  0x2c   :  { %53 = vadd.xlane.f32.xlu0 %v52_v8 }
  0x2d   :  { %p245_p5 = por %p244_p4, %p243_p3 }
  0x2f   :  { %p246_p6 = pnand %p245_p5, %p239_p2 }
  0x30   :  { %58 = vadd.xlane.f32.xlu0 %v57_v9 }
  0xb9   :  { %v54_v15 = vpop.xlane.xlu0 %53 }
  0xba   :  { %v75_v18 = vrot.slane %v54_v15, %v74_v16 }
  0xbd   :  { %v59_v17 = vpop.xlane.xlu0 %58 }
  0xbe   :  { %v79_v19 = vrot.slane %v59_v17, %v74_v16 }
  0xc0   :  { %v81_v20 = vsel %vm80_vm2, %v79_v19, %v75_v18 }
  0xc1   :  { %183 = vmatmul.mubr.msk.f32.vlgmr.msra.gmra.mrb[0].mxu0 %vm82_vm3, %v81_v20 }
 0x194   :  { %v154_v22 = vpop.f32.mrb[0].mxu0 }
 0x195   :  { %v155_v23 = vadd.f32 %v175_v21, %v154_v22  ;;  %v184_v24 = vpop.f32.mrb[1].mxu0 }
 0x197   :  { %158 = vst [vmem:[#allocation7] sm:$0x3] %v155_v23 }
 0x198   :  { %249 = shalt.err (!%p246_p6)
}
 0x199   :  { %s250_s16 = scalar_lea.hbm %s340_s3, 32 }
 0x19a   :  { %p251_p7 = scmp.ne.s32.totalorder %s340_s3, %s250_s16  ;;  %p254_p8 = scmp.lt.u32.totalorder %s250_s16, %s340_s3 }
 0x19c   :  { %p256_p9 = pnand %p254_p8, %p251_p7 }
 0x19e   :  { %259 = shalt.err (!%p256_p9)
}
 0x19f   :  { %168 = dma.vmem_to_hbm [thread:$0]  %s166_s12, 32, %s340_s3, [#allocation4]  }
 0x1a0   :  { %264 = dma.done.wait [#allocation4], 32  }
 0x1a1   :  { %265 = vsyncadd [#allocation4], 4294967264 }
 0x1a2   :  { %172 = vsyncpa [#allocation3], 1 }
 0x1a3   :  { %173 = vsyncpa [#allocation6], 1 }
 0x1a4   :  { %174 = vsyncpa [#allocation4], 1 }

</bundles_post_ra>
